<compile_context>
chip_gen: v6e
topology: v6e:2x2x1
jax: 0.10.0
libtpu: 0.0.40
codegen_flags: <defaults>
</compile_context>

<pallas_src>
import numpy as np
import jax
import jax.numpy as jnp
from jax.experimental import pallas as pl
from jax.experimental.pallas import tpu as pltpu


def _round_up(x, m):
    return ((x + m - 1) // m) * m


# --------------------------------------------------------------------------- #
# Kernels
# --------------------------------------------------------------------------- #
def _head_kernel_single_k(x_ref, w_ref, o_ref):
    """tk == K: one MXU matmul per (vocab, M) tile, no accumulation needed."""
    o_ref[...] = jnp.dot(
        x_ref[...], w_ref[...], preferred_element_type=jnp.float32
    ).astype(o_ref.dtype)


def _head_kernel_acc_f32(x_ref, w_ref, o_ref):
    """K-tiled path, fp32 output: accumulate directly into the resident output."""
    @pl.when(pl.program_id(2) == 0)
    def _():
        o_ref[...] = jnp.zeros_like(o_ref)

    o_ref[...] += jnp.dot(x_ref[...], w_ref[...], preferred_element_type=jnp.float32)


def _head_kernel_acc(x_ref, w_ref, o_ref, acc_ref):
    """K-tiled path, non-fp32 output: fp32 scratch accumulator, cast at the end."""
    @pl.when(pl.program_id(2) == 0)
    def _():
        acc_ref[...] = jnp.zeros_like(acc_ref)

    acc_ref[...] += jnp.dot(x_ref[...], w_ref[...], preferred_element_type=jnp.float32)

    @pl.when(pl.program_id(2) == pl.num_programs(2) - 1)
    def _():
        o_ref[...] = acc_ref[...].astype(o_ref.dtype)


# --------------------------------------------------------------------------- #
# Module-equivalent wrapper
# --------------------------------------------------------------------------- #
class Head:
    """Pallas TPU equivalent of nn.Linear(dmodel, vocab_size, bias=False).

    The weight (shape (vocab_size, dmodel), native PyTorch Linear layout) is
    prepared once at construction: cast to `compute_dtype`, transposed to
    (dmodel, vocab) for a transpose-free MXU matmul, and padded to tile
    multiples. The per-call forward only casts/pads the (much smaller)
    activation.
    """

    def __init__(self, weight, *, compute_dtype=jnp.bfloat16, out_dtype=None,
                 tm_max=512, tn_max=2048, tk_max=2048):
        weight = jnp.asarray(weight)
        vocab_size, dmodel = weight.shape
        self.N = int(vocab_size)
        self.K = int(dmodel)
        self.compute_dtype = compute_dtype
        self.out_dtype = out_dtype
        self.tm_max = int(tm_max)

        # --- tk: full K whenever it fits (collapses the K grid axis to 1). ---
        if self.K <= tk_max:
            tk = self.K
        else:
            tk = tk_max
            if self.K % 128 == 0:
                # Prefer a divisor of K (multiple of 128) so x never needs K-pad.
                for cand in range(tk_max, 127, -128):
                    if self.K % cand == 0:
                        tk = cand
                        break
        Kp = _round_up(self.K, tk)

        # --- tn: lane-dense (multiple of 128) vocab tile. ---
        tn = min(int(tn_max), _round_up(self.N, 128))
        Np = _round_up(self.N, tn)

        self.tk, self.tn = int(tk), int(tn)
        self.Kp, self.Np = int(Kp), int(Np)

        # One-time weight preparation: cast + transpose + pad (never per forward).
        wT = weight.T.astype(compute_dtype)                      # (dmodel, vocab)
        if (Kp, Np) != (self.K, self.N):
            wT = jnp.pad(wT, ((0, Kp - self.K), (0, Np - self.N)))
        self.wT = jax.block_until_ready(wT)

    def __call__(self, x):
        lead_shape = x.shape[:-1]
        K = x.shape[-1]
        assert K == self.K, (K, self.K)
        M = int(np.prod(lead_shape)) if lead_shape else 1
        out_dtype = self.out_dtype if self.out_dtype is not None else x.dtype

        # M tile: multiple of 16 (bf16 sublane packing), up to tm_max.
        tm = min(self.tm_max, _round_up(M, 16))
        Mp = _round_up(M, tm)

        x2d = x.reshape(M, K).astype(self.compute_dtype)
        if (Mp, self.Kp) != (M, K):
            x2d = jnp.pad(x2d, ((0, Mp - M), (0, self.Kp - K)))

        n_grid = self.Np // self.tn
        m_grid = Mp // tm
        k_grid = self.Kp // self.tk

        in_b = np.dtype(self.compute_dtype).itemsize
        out_b = np.dtype(out_dtype).itemsize
        out_is_f32 = np.dtype(out_dtype) == np.dtype(np.float32)

        # Double-buffered working set; cap the limit at 64 MiB (v7x physical VMEM).
        need = 2 * (tm * self.tk + self.tk * self.tn) * in_b + 2 * tm * self.tn * out_b
        if k_grid > 1 and not out_is_f32:
            need += tm * self.tn * 4
        vmem_limit = int(min(64 * 1024 * 1024,
                             max(32 * 1024 * 1024, need + (8 << 20))))

        if k_grid == 1:
            # Pure 2D parallel grid; weight tile resident across the inner M sweep
            # -> the large weight is streamed from HBM exactly once per forward.
            kernel = _head_kernel_single_k
            grid = (n_grid, m_grid)
            in_specs = [
                pl.BlockSpec((tm, self.tk), lambda j, i: (i, 0)),
                pl.BlockSpec((self.tk, self.tn), lambda j, i: (0, j)),
            ]
            out_spec = pl.BlockSpec((tm, self.tn), lambda j, i: (i, j))
            scratch = []
            semantics = ("parallel", "parallel")
        else:
            kernel = _head_kernel_acc_f32 if out_is_f32 else _head_kernel_acc
            grid = (n_grid, m_grid, k_grid)
            in_specs = [
                pl.BlockSpec((tm, self.tk), lambda j, i, k: (i, k)),
                pl.BlockSpec((self.tk, self.tn), lambda j, i, k: (k, j)),
            ]
            out_spec = pl.BlockSpec((tm, self.tn), lambda j, i, k: (i, j))
            scratch = [] if out_is_f32 else [pltpu.VMEM((tm, self.tn), jnp.float32)]
            semantics = ("parallel", "parallel", "arbitrary")

        out2d = pl.pallas_call(
            kernel,
            out_shape=jax.ShapeDtypeStruct((Mp, self.Np), out_dtype),
            grid_spec=pltpu.PrefetchScalarGridSpec(
                num_scalar_prefetch=0,
                grid=grid,
                in_specs=in_specs,
                out_specs=out_spec,
                scratch_shapes=scratch,
            ),
            compiler_params=pltpu.CompilerParams(
                dimension_semantics=semantics,
                vmem_limit_bytes=vmem_limit,
            ),
        )(x2d, self.wT)

        # Slice only if padding actually happened (no-op for 128-multiple shapes).
        if (Mp, self.Np) != (M, self.N):
            out2d = out2d[:M, :self.N]
        return out2d.reshape(*lead_shape, self.N)


# --------------------------------------------------------------------------- #
# Demo / self-test
# --------------------------------------------------------------------------- #
if __name__ == "__main__":
    # Small shapes consistent with the module: batch=2, seq=8, dmodel=32, vocab=128
    B, T, dmodel, vocab_size = 2, 8, 32, 128

    key = jax.random.PRNGKey(0)
    kx, kw = jax.random.split(key)
    x = jax.random.normal(kx, (B, T, dmodel), dtype=jnp.float32)
    # Deterministic "Linear" weight (shape matches nn.Linear(dmodel, vocab).weight)
    weight = jax.random.normal(kw, (vocab_size, dmodel), dtype=jnp.float32) * (
        1.0 / jnp.sqrt(dmodel)
    )

    head = Head(weight)           # one-time weight prep (cast/transpose/pad)
    out = head(x)
    out = jax.block_until_ready(out)

    # Reference with the same bf16 input rounding + fp32 accumulation
    x_bf = x.astype(jnp.bfloat16).astype(jnp.float32)
    w_bf = weight.astype(jnp.bfloat16).astype(jnp.float32)
    ref = jnp.einsum("btd,vd->btv", x_bf, w_bf)

    assert out.shape == (B, T, vocab_size)
    assert jnp.allclose(out, ref, atol=2e-3, rtol=2e-3), float(
        jnp.max(jnp.abs(out - ref))
    )

    print("KERNEL_OK")
</pallas_src>

<mosaic_0001>
module attributes {stable_mosaic.version = 11 : i64} {
  func.func @_head_kernel_single_k(%arg0: i32, %arg1: i32, %arg2: memref<16x32xbf16, #tpu.memory_space<vmem>>, %arg3: memref<32x128xbf16, #tpu.memory_space<vmem>>, %arg4: memref<16x128xf32, #tpu.memory_space<vmem>>) attributes {dimension_semantics = [#tpu.dimension_semantics<parallel>, #tpu.dimension_semantics<parallel>], iteration_bounds = array<i64: 1, 1>, scalar_prefetch = 0 : i64, scratch_operands = 0 : i64, tpu.core_type = #tpu.core_type<tc>, window_params = [{transform_indices = @transform_0, window_bounds = array<i64: 16, 32>}, {transform_indices = @transform_1, window_bounds = array<i64: 32, 128>}, {transform_indices = @transform_2, window_bounds = array<i64: 16, 128>}]} {
    %c0 = arith.constant 0 : index
    %c0_0 = arith.constant 0 : index
    %0 = vector.load %arg2[%c0, %c0_0] : memref<16x32xbf16, #tpu.memory_space<vmem>>, vector<16x32xbf16>
    %c0_1 = arith.constant 0 : index
    %c0_2 = arith.constant 0 : index
    %1 = vector.load %arg3[%c0_1, %c0_2] : memref<32x128xbf16, #tpu.memory_space<vmem>>, vector<32x128xbf16>
    %cst = arith.constant dense<0.000000e+00> : vector<16x128xf32>
    %2 = tpu.matmul %0, %1, %cst {dimension_numbers = #tpu.dot_dimension_numbers<[1], [0], [0], [1], [0, 0, 1, 1], [], []>} : vector<16x32xbf16>, vector<32x128xbf16>, vector<16x128xf32> -> vector<16x128xf32>
    %c0_3 = arith.constant 0 : index
    %c0_4 = arith.constant 0 : index
    %3 = vector.load %arg4[%c0_3, %c0_4] : memref<16x128xf32, #tpu.memory_space<vmem>>, vector<16x128xf32>
    tpu.vector_store %arg4[%c0_3, %c0_4], %2 {strides = array<i32>} : memref<16x128xf32, #tpu.memory_space<vmem>>, vector<16x128xf32>,
    return
  }
  func.func @transform_0(%arg0: i32, %arg1: i32) -> (i32, i32) {
    %c0_i32 = arith.constant 0 : i32
    %c0_i32_0 = arith.constant 0 : i32
    return %arg1, %c0_i32 : i32, i32
  }
  func.func @transform_1(%arg0: i32, %arg1: i32) -> (i32, i32) {
    %c0_i32 = arith.constant 0 : i32
    %c0_i32_0 = arith.constant 0 : i32
    return %c0_i32, %arg0 : i32, i32
  }
  func.func @transform_2(%arg0: i32, %arg1: i32) -> (i32, i32) {
    %c0_i32 = arith.constant 0 : i32
    return %arg1, %arg0 : i32, i32
  }
}

</mosaic_0001>

<bundles_post_ra>
// kernel: tpu_custom_call.1
= control target key start
LH: loop header
LB: loop body
LE: loop exit
PB: predicated region body
PF: predicated region fallthrough
CT: control target
= control target key end

     0   :  { %7 = vsyncpa [#allocation3], 0  ;;  %s255_s0 = inlined_call_operand.hbm [shape: bf16[16,32], index: 0, kind: input, shape index: {}]   ;;  %s256_s1 = inlined_call_operand.hbm [shape: bf16[32,128], index: 1, kind: input, shape index: {}]   ;;  %s257_s2 = inlined_call_operand.hbm [shape: f32[16,128], index: 2, kind: output, shape index: {}]  }
   0x1   :  { %8 = vsyncpa [#allocation6], 0 }
   0x2   :  { %9 = vsyncpa [#allocation4], 0  ;;  %s222_s9 = smov [#allocation2]  }
   0x3   :  { %s15_s10 = sshll.u32 %s222_s9, 4  ;;  %s16_s10 = int_to_ptr.vmem [resolvable:$true] %s15_s10 }
   0x4   :  { %s164_s11 = scalar_lea.vmem %s16_s10, 128  ;;  %p169_p1 = scmp.lt.s32.totalorder %s16_s10, %s16_s10 }
   0x5   :  { %p165_p0 = scmp.ne.s32.totalorder %s16_s10, %s164_s11  ;;  %p170_p2 = scmp.lt.s32.totalorder %s164_s11, %s164_s11 }
   0x7   :  { %p171_p3 = por %p170_p2, %p169_p1 }
   0x9   :  { %p172_p4 = pnand %p171_p3, %p165_p0 }
   0xb   :  { %175 = shalt.err (!%p172_p4)
}
   0xc   :  { %s223_s12 = smov 64   ;;  %s224_s13 = smov 4  }
   0xd   :  { %21 = dma.hbm_to_vmem [thread:$0]  %s255_s0, 128, %s16_s10, [#allocation3], %s223_s12, %s223_s12, %s224_s13  }
   0xe   :  { %s225_s16 = smov [#allocation5]  }
   0xf   :  { %s27_s17 = sshll.u32 %s225_s16, 4  ;;  %s28_s17 = int_to_ptr.vmem [resolvable:$true] %s27_s17 }
  0x10   :  { %s184_s18 = scalar_lea.vmem %s28_s17, 256  ;;  %p189_p6 = scmp.lt.s32.totalorder %s28_s17, %s28_s17 }
  0x11   :  { %p185_p5 = scmp.ne.s32.totalorder %s28_s17, %s184_s18  ;;  %p190_p7 = scmp.lt.s32.totalorder %s184_s18, %s184_s18 }
  0x13   :  { %p191_p8 = por %p190_p7, %p189_p6 }
  0x15   :  { %p192_p9 = pnand %p191_p8, %p185_p5 }
  0x17   :  { %195 = shalt.err (!%p192_p9)
}
  0x18   :  { %33 = dma.hbm_to_vmem [thread:$0]  %s256_s1, 256, %s28_s17, [#allocation6], %s223_s12, %s223_s12, %s224_s13  }
  0x19   :  { %216 = dma.done.wait [#allocation3], 128  }
  0x1a   :  { %217 = vsyncadd [#allocation3], 4294967168 }
  0x1b   :  { %218 = dma.done.wait [#allocation6], 256  }
  0x1c   :  { %219 = vsyncadd [#allocation6], 4294967040  ;;  %v226_v0 = vmov 0.0   ;;  %vm227_vm0 = vmmov 0   ;;  %v153_v1 = vld [vmem:[#allocation5 + $0x8] sm:$0xff]   ;;  %v154_v2 = vld [vmem:[#allocation5] sm:$0xff]  }
  0x1d   :  { %136 = vmatprep.subr.bf16.mxu0 %v226_v0  ;;  %140 = vmatprep.mubr.msk.bf16.mxu0 %vm227_vm0, %v226_v0  ;;  %v155_v3 = vld [vmem:[#allocation2] sm:$0xff]   ;;  %vm64_vm1 = vcmask 261120   ;;  %s228_s0 = smov [#allocation7]  }
  0x1e   :  { %137 = vmatpush3.bf16.msra.mxu0 %v153_v1  ;;  %s116_s21 = sshll.u32 %s228_s0, 4  ;;  %s117_s21 = int_to_ptr.vmem [resolvable:$true] %s116_s21 }
  0x1f   :  { %138 = vmatprep.subr.bf16.mxu0 %v226_v0  ;;  %s196_s1 = scalar_lea.vmem %s117_s21, 256  ;;  %p201_p11 = scmp.lt.s32.totalorder %s117_s21, %s117_s21 }
  0x20   :  { %p197_p10 = scmp.ne.s32.totalorder %s117_s21, %s196_s1  ;;  %p202_p12 = scmp.lt.s32.totalorder %s196_s1, %s196_s1 }
  0x22   :  { %139 = vmatpush3.bf16.msra.mxu0 %v154_v2  ;;  %p203_p13 = por %p202_p12, %p201_p11 }
  0x24   :  { %p204_p0 = pnand %p203_p13, %p197_p10 }
  0x25   :  { %141 = vmatmul.mubr.msk.bf16.vlgmr.msra.gmra.mxu0 %vm64_vm1, %v155_v3 }
  0xe5   :  { %v102_v4 = vpop.f32.mrf.mxu0 }
  0xe6   :  { %109 = vst [vmem:[#allocation7] sm:$0xff] %v102_v4 }
  0xe7   :  { %v142_v5 = vpop.f32.mrf.mxu0 }
  0xe9   :  { %v105_v6 = vpop.f32.mrf.mxu0 }
  0xea   :  { %110 = vst [vmem:[#allocation7 + $0x8] sm:$0xff] %v105_v6 }
  0xeb   :  { %v143_v7 = vpop.f32.mrf.mxu0 }
  0xec   :  { %207 = shalt.err (!%p204_p0)
}
  0xed   :  { %s229_s22 = smov 128   ;;  %s230_s23 = smov 8  }
  0xee   :  { %122 = dma.vmem_to_hbm [thread:$0]  %s117_s21, 256, %s257_s2, [#allocation4], %s229_s22, %s229_s22, %s230_s23  }
  0xef   :  { %220 = dma.done.wait [#allocation4], 256  }
  0xf0   :  { %221 = vsyncadd [#allocation4], 4294967040 }
  0xf1   :  { %126 = vsyncpa [#allocation3], 1 }
  0xf2   :  { %127 = vsyncpa [#allocation6], 1 }
  0xf3   :  { %128 = vsyncpa [#allocation4], 1 }

</bundles_post_ra>
